<compile_context>
chip_gen: v7x
topology: tpu7x:2x2x1
jax: 0.10.0
libtpu: 0.0.40
codegen_flags: <defaults>
</compile_context>

<pallas_src>
import jax
import jax.numpy as jnp
import numpy as np
from jax import lax
from jax.experimental import pallas as pl
from jax.experimental.pallas import tpu as pltpu


def _lstm_chunk_kernel(gx_ref, whh_ref, h_out_ref, h_scr, c_scr):
    """Grid = (batch_blocks, time_chunks); one step = Tc timesteps of one block.

    gx_ref:    (Tc, Bb, 4H)  precomputed input projection (x @ W_ih^T + b)
    whh_ref:   (H, 4H)       W_hh^T
    h_out_ref: (Tc, Bb, H)   hidden states for the chunk
    h_scr/c_scr: (Bb, H)     recurrent carry across time chunks
    """
    ci = pl.program_id(1)  # time-chunk index (innermost, "arbitrary")

    @pl.when(ci == 0)
    def _():
        h_scr[...] = jnp.zeros_like(h_scr)
        c_scr[...] = jnp.zeros_like(c_scr)

    Tc, Bb, H4 = gx_ref.shape
    H = h_scr.shape[1]

    whh = whh_ref[...]

    def step(t, carry):
        h_prev, c_prev = carry
        # Only the recurrent matmul remains on the sequential critical path.
        gates = gx_ref[t] + jnp.dot(h_prev, whh,
                                    preferred_element_type=jnp.float32)
        # Two full-vreg EUP pushes instead of four per-gate pushes.
        sig = jax.nn.sigmoid(gates)
        tnh = jnp.tanh(gates)
        # PyTorch LSTM gate order: i, f, g, o.
        i_g = sig[:, 0 * H:1 * H]
        f_g = sig[:, 1 * H:2 * H]
        g_g = tnh[:, 2 * H:3 * H]
        o_g = sig[:, 3 * H:4 * H]
        c_new = f_g * c_prev + i_g * g_g
        h_new = o_g * jnp.tanh(c_new)
        h_out_ref[t] = h_new
        return h_new, c_new

    h_fin, c_fin = lax.fori_loop(0, Tc, step, (h_scr[...], c_scr[...]),
                                 unroll=min(8, Tc))
    h_scr[...] = h_fin
    c_scr[...] = c_fin


def _round_up(x, m):
    return ((x + m - 1) // m) * m


def rnn_forward(x, params, *, time_chunk=256, batch_block=128):
    """x: [B, T, D] float32. Returns [B, T, 2] (same semantics as RNN.forward)."""
    B, T, D = x.shape
    w_ih, w_hh = params["w_ih"], params["w_hh"]
    b_ih, b_hh = params["b_ih"], params["b_hh"]
    w_fc, b_fc = params["w_fc"], params["b_fc"]
    H4 = w_ih.shape[0]
    H = H4 // 4

    # Batch blocking: pad batch to sublanes; block it so v7x cores can shard it.
    Bb = min(_round_up(B, 8), batch_block)
    Bp = _round_up(B, Bb)
    n_bb = Bp // Bb

    # Time chunking: amortize per-grid-step overhead, capped by a VMEM budget
    # (gx + h_out blocks, double buffered).
    bytes_per_t = Bb * (H4 + H) * 4 * 2
    vmem_budget = 24 * 1024 * 1024
    max_tc = max(8, vmem_budget // max(bytes_per_t, 1))
    Tc = max(1, min(time_chunk, T, max_tc))
    n_chunks = -(-T // Tc)
    Tp = n_chunks * Tc

    # Input projection hoisted out of the kernel entirely (one big XLA matmul).
    gx = x @ jnp.transpose(w_ih) + (b_ih + b_hh)          # (B, T, 4H)
    gx_tm = jnp.transpose(gx, (1, 0, 2))                   # (T, B, 4H)
    # Zero padding: padded batch rows are independent (W_hh mixes hidden dims,
    # not batch rows); padded trailing timesteps come after every real step and
    # are sliced off below.
    gx_tm = jnp.pad(gx_tm, ((0, Tp - T), (0, Bp - B), (0, 0)))

    whh_t = jnp.transpose(w_hh)                            # (H, 4H)

    h_tm = pl.pallas_call(
        _lstm_chunk_kernel,
        out_shape=jax.ShapeDtypeStruct((Tp, Bp, H), jnp.float32),
        grid_spec=pltpu.PrefetchScalarGridSpec(
            num_scalar_prefetch=0,
            grid=(n_bb, n_chunks),
            in_specs=[
                pl.BlockSpec((Tc, Bb, H4), lambda bi, ci: (ci, bi, 0)),
                pl.BlockSpec((H, H4), lambda bi, ci: (0, 0)),
            ],
            out_specs=pl.BlockSpec((Tc, Bb, H), lambda bi, ci: (ci, bi, 0)),
            scratch_shapes=[
                pltpu.VMEM((Bb, H), jnp.float32),   # h carry
                pltpu.VMEM((Bb, H), jnp.float32),   # c carry
            ],
        ),
        compiler_params=pltpu.CompilerParams(
            dimension_semantics=("parallel", "arbitrary"),
            vmem_limit_bytes=32 * 1024 * 1024,
        ),
    )(gx_tm, whh_t)

    # Final Linear(hidden -> 2) hoisted out of the recurrence (lane-narrow N=2).
    h = jnp.transpose(h_tm[:T, :B, :], (1, 0, 2))          # (B, T, H)
    return h @ jnp.transpose(w_fc) + b_fc                  # (B, T, 2)


def rnn_forward_ref(x, params):
    """Pure-JAX reference (lax.scan) mirroring torch.nn.LSTM + Linear."""
    B, T, D = x.shape
    w_ih, w_hh = params["w_ih"], params["w_hh"]
    b_ih, b_hh = params["b_ih"], params["b_hh"]
    w_fc, b_fc = params["w_fc"], params["b_fc"]
    H = w_hh.shape[1]

    def step(carry, x_t):
        h, c = carry
        gates = x_t @ w_ih.T + b_ih + h @ w_hh.T + b_hh
        i = jax.nn.sigmoid(gates[:, 0 * H:1 * H])
        f = jax.nn.sigmoid(gates[:, 1 * H:2 * H])
        g = jnp.tanh(gates[:, 2 * H:3 * H])
        o = jax.nn.sigmoid(gates[:, 3 * H:4 * H])
        c = f * c + i * g
        h = o * jnp.tanh(c)
        return (h, c), h

    h0 = jnp.zeros((B, H), jnp.float32)
    c0 = jnp.zeros((B, H), jnp.float32)
    _, hs = lax.scan(step, (h0, c0), jnp.transpose(x, (1, 0, 2)))
    out = hs @ w_fc.T + b_fc                # (T, B, 2)
    return jnp.transpose(out, (1, 0, 2))


def init_params(key, input_dim, hidden_dim):
    k1, k2, k3, k4, k5, k6 = jax.random.split(key, 6)
    std = 0.001
    bound = 1.0 / np.sqrt(hidden_dim)
    return {
        "w_ih": std * jax.random.normal(k1, (4 * hidden_dim, input_dim), jnp.float32),
        "w_hh": std * jax.random.normal(k2, (4 * hidden_dim, hidden_dim), jnp.float32),
        "b_ih": std * jax.random.normal(k3, (4 * hidden_dim,), jnp.float32),
        "b_hh": std * jax.random.normal(k4, (4 * hidden_dim,), jnp.float32),
        "w_fc": jax.random.uniform(k5, (2, hidden_dim), jnp.float32, -bound, bound),
        "b_fc": jax.random.uniform(k6, (2,), jnp.float32, -bound, bound),
    }


if __name__ == "__main__":
    B, T, D, H = 2, 8, 16, 32
    key = jax.random.PRNGKey(0)
    kx, kp = jax.random.split(key)
    x = jax.random.normal(kx, (B, T, D), jnp.float32)
    params = init_params(kp, D, H)

    out = jax.block_until_ready(rnn_forward(x, params))
    ref = jax.block_until_ready(rnn_forward_ref(x, params))

    assert out.shape == (B, T, 2)
    np.testing.assert_allclose(np.asarray(out), np.asarray(ref), rtol=1e-5, atol=1e-5)
    print("KERNEL_OK")
</pallas_src>

<mosaic_0001>
module attributes {stable_mosaic.version = 11 : i64} {
  func.func @_lstm_chunk_kernel(%arg0: i32, %arg1: i32, %arg2: memref<8x8x128xf32, #tpu.memory_space<vmem>>, %arg3: memref<32x128xf32, #tpu.memory_space<vmem>>, %arg4: memref<8x8x32xf32, #tpu.memory_space<vmem>>, %arg5: memref<8x32xf32, #tpu.memory_space<vmem>>, %arg6: memref<8x32xf32, #tpu.memory_space<vmem>>) attributes {dimension_semantics = [#tpu.dimension_semantics<parallel>, #tpu.dimension_semantics<arbitrary>], iteration_bounds = array<i64: 1, 1>, scalar_prefetch = 0 : i64, scratch_operands = 2 : i64, tpu.core_type = #tpu.core_type<tc>, window_params = [{transform_indices = @transform_0, window_bounds = array<i64: 8, 8, 128>}, {pipeline_mode = #tpu.pipeline_mode<synchronous>, transform_indices = @transform_1, window_bounds = array<i64: 32, 128>}, {transform_indices = @transform_2, window_bounds = array<i64: 8, 8, 32>}]} {
    %c0_i32 = arith.constant 0 : i32
    %0 = arith.cmpi eq, %arg1, %c0_i32 : i32
    %1 = arith.extui %0 : i1 to i32
    %c0_i32_0 = arith.constant 0 : i32
    %2 = arith.cmpi ne, %1, %c0_i32_0 : i32
    scf.if %2 {
      %cst_58 = arith.constant 0.000000e+00 : f32
      %200 = vector.broadcast %cst_58 : f32 to vector<8x32xf32>
      %c0_59 = arith.constant 0 : index
      %c0_60 = arith.constant 0 : index
      %201 = vector.load %arg5[%c0_59, %c0_60] : memref<8x32xf32, #tpu.memory_space<vmem>>, vector<8x32xf32>
      tpu.vector_store %arg5[%c0_59, %c0_60], %200 {strides = array<i32>} : memref<8x32xf32, #tpu.memory_space<vmem>>, vector<8x32xf32>,
      %cst_61 = arith.constant 0.000000e+00 : f32
      %202 = vector.broadcast %cst_61 : f32 to vector<8x32xf32>
      %c0_62 = arith.constant 0 : index
      %c0_63 = arith.constant 0 : index
      %203 = vector.load %arg6[%c0_62, %c0_63] : memref<8x32xf32, #tpu.memory_space<vmem>>, vector<8x32xf32>
      tpu.vector_store %arg6[%c0_62, %c0_63], %202 {strides = array<i32>} : memref<8x32xf32, #tpu.memory_space<vmem>>, vector<8x32xf32>,
    } else {
    }
    %c0 = arith.constant 0 : index
    %c0_1 = arith.constant 0 : index
    %3 = vector.load %arg3[%c0, %c0_1] : memref<32x128xf32, #tpu.memory_space<vmem>>, vector<32x128xf32>
    %c0_2 = arith.constant 0 : index
    %c0_3 = arith.constant 0 : index
    %4 = vector.load %arg5[%c0_2, %c0_3] : memref<8x32xf32, #tpu.memory_space<vmem>>, vector<8x32xf32>
    %c0_4 = arith.constant 0 : index
    %c0_5 = arith.constant 0 : index
    %5 = vector.load %arg6[%c0_4, %c0_5] : memref<8x32xf32, #tpu.memory_space<vmem>>, vector<8x32xf32>
    %c0_i32_6 = arith.constant 0 : i32
    %6 = arith.index_cast %c0_i32_6 : i32 to index
    %c0_7 = arith.constant 0 : index
    %c0_8 = arith.constant 0 : index
    %7 = vector.load %arg2[%6, %c0_7, %c0_8] : memref<8x8x128xf32, #tpu.memory_space<vmem>>, vector<1x8x128xf32>
    %8 = vector.shape_cast %7 : vector<1x8x128xf32> to vector<8x128xf32>
    %cst = arith.constant dense<0.000000e+00> : vector<8x128xf32>
    %9 = tpu.matmul %4, %3, %cst {dimension_numbers = #tpu.dot_dimension_numbers<[1], [0], [0], [1], [0, 0, 1, 1], [], []>} : vector<8x32xf32>, vector<32x128xf32>, vector<8x128xf32> -> vector<8x128xf32>
    %10 = arith.addf %8, %9 : vector<8x128xf32>
    %11 = arith.negf %10 : vector<8x128xf32>
    %12 = math.exp %11 : vector<8x128xf32>
    %cst_9 = arith.constant 1.000000e+00 : f32
    %13 = vector.broadcast %cst_9 : f32 to vector<8x128xf32>
    %14 = arith.addf %13, %12 : vector<8x128xf32>
    %15 = arith.divf %13, %14 : vector<8x128xf32>
    %16 = math.tanh %10 : vector<8x128xf32>
    %17 = vector.extract_strided_slice %15 {offsets = [0, 0], sizes = [8, 32], strides = [1, 1]} : vector<8x128xf32> to vector<8x32xf32>
    %18 = vector.extract_strided_slice %15 {offsets = [0, 32], sizes = [8, 32], strides = [1, 1]} : vector<8x128xf32> to vector<8x32xf32>
    %19 = vector.extract_strided_slice %16 {offsets = [0, 64], sizes = [8, 32], strides = [1, 1]} : vector<8x128xf32> to vector<8x32xf32>
    %20 = vector.extract_strided_slice %15 {offsets = [0, 96], sizes = [8, 32], strides = [1, 1]} : vector<8x128xf32> to vector<8x32xf32>
    %21 = arith.mulf %18, %5 : vector<8x32xf32>
    %22 = arith.mulf %17, %19 : vector<8x32xf32>
    %23 = arith.addf %21, %22 : vector<8x32xf32>
    %24 = math.tanh %23 : vector<8x32xf32>
    %25 = arith.mulf %20, %24 : vector<8x32xf32>
    %26 = arith.index_cast %c0_i32_6 : i32 to index
    %c0_10 = arith.constant 0 : index
    %c0_11 = arith.constant 0 : index
    %27 = vector.load %arg4[%26, %c0_10, %c0_11] : memref<8x8x32xf32, #tpu.memory_space<vmem>>, vector<1x8x32xf32>
    %28 = vector.shape_cast %27 : vector<1x8x32xf32> to vector<8x32xf32>
    %29 = vector.shape_cast %25 : vector<8x32xf32> to vector<1x8x32xf32>
    tpu.vector_store %arg4[%26, %c0_10, %c0_11], %29 {strides = array<i32>} : memref<8x8x32xf32, #tpu.memory_space<vmem>>, vector<1x8x32xf32>,
    %c1_i32 = arith.constant 1 : i32
    %30 = arith.index_cast %c1_i32 : i32 to index
    %c0_12 = arith.constant 0 : index
    %c0_13 = arith.constant 0 : index
    %31 = vector.load %arg2[%30, %c0_12, %c0_13] : memref<8x8x128xf32, #tpu.memory_space<vmem>>, vector<1x8x128xf32>
    %32 = vector.shape_cast %31 : vector<1x8x128xf32> to vector<8x128xf32>
    %cst_14 = arith.constant dense<0.000000e+00> : vector<8x128xf32>
    %33 = tpu.matmul %25, %3, %cst_14 {dimension_numbers = #tpu.dot_dimension_numbers<[1], [0], [0], [1], [0, 0, 1, 1], [], []>} : vector<8x32xf32>, vector<32x128xf32>, vector<8x128xf32> -> vector<8x128xf32>
    %34 = arith.addf %32, %33 : vector<8x128xf32>
    %35 = arith.negf %34 : vector<8x128xf32>
    %36 = math.exp %35 : vector<8x128xf32>
    %cst_15 = arith.constant 1.000000e+00 : f32
    %37 = vector.broadcast %cst_15 : f32 to vector<8x128xf32>
    %38 = arith.addf %37, %36 : vector<8x128xf32>
    %39 = arith.divf %37, %38 : vector<8x128xf32>
    %40 = math.tanh %34 : vector<8x128xf32>
    %41 = vector.extract_strided_slice %39 {offsets = [0, 0], sizes = [8, 32], strides = [1, 1]} : vector<8x128xf32> to vector<8x32xf32>
    %42 = vector.extract_strided_slice %39 {offsets = [0, 32], sizes = [8, 32], strides = [1, 1]} : vector<8x128xf32> to vector<8x32xf32>
    %43 = vector.extract_strided_slice %40 {offsets = [0, 64], sizes = [8, 32], strides = [1, 1]} : vector<8x128xf32> to vector<8x32xf32>
    %44 = vector.extract_strided_slice %39 {offsets = [0, 96], sizes = [8, 32], strides = [1, 1]} : vector<8x128xf32> to vector<8x32xf32>
    %45 = arith.mulf %42, %23 : vector<8x32xf32>
    %46 = arith.mulf %41, %43 : vector<8x32xf32>
    %47 = arith.addf %45, %46 : vector<8x32xf32>
    %48 = math.tanh %47 : vector<8x32xf32>
    %49 = arith.mulf %44, %48 : vector<8x32xf32>
    %50 = arith.index_cast %c1_i32 : i32 to index
    %c0_16 = arith.constant 0 : index
    %c0_17 = arith.constant 0 : index
    %51 = vector.load %arg4[%50, %c0_16, %c0_17] : memref<8x8x32xf32, #tpu.memory_space<vmem>>, vector<1x8x32xf32>
    %52 = vector.shape_cast %51 : vector<1x8x32xf32> to vector<8x32xf32>
    %53 = vector.shape_cast %49 : vector<8x32xf32> to vector<1x8x32xf32>
    tpu.vector_store %arg4[%50, %c0_16, %c0_17], %53 {strides = array<i32>} : memref<8x8x32xf32, #tpu.memory_space<vmem>>, vector<1x8x32xf32>,
    %c2_i32 = arith.constant 2 : i32
    %54 = arith.index_cast %c2_i32 : i32 to index
    %c0_18 = arith.constant 0 : index
    %c0_19 = arith.constant 0 : index
    %55 = vector.load %arg2[%54, %c0_18, %c0_19] : memref<8x8x128xf32, #tpu.memory_space<vmem>>, vector<1x8x128xf32>
    %56 = vector.shape_cast %55 : vector<1x8x128xf32> to vector<8x128xf32>
    %cst_20 = arith.constant dense<0.000000e+00> : vector<8x128xf32>
    %57 = tpu.matmul %49, %3, %cst_20 {dimension_numbers = #tpu.dot_dimension_numbers<[1], [0], [0], [1], [0, 0, 1, 1], [], []>} : vector<8x32xf32>, vector<32x128xf32>, vector<8x128xf32> -> vector<8x128xf32>
    %58 = arith.addf %56, %57 : vector<8x128xf32>
    %59 = arith.negf %58 : vector<8x128xf32>
    %60 = math.exp %59 : vector<8x128xf32>
    %cst_21 = arith.constant 1.000000e+00 : f32
    %61 = vector.broadcast %cst_21 : f32 to vector<8x128xf32>
    %62 = arith.addf %61, %60 : vector<8x128xf32>
    %63 = arith.divf %61, %62 : vector<8x128xf32>
    %64 = math.tanh %58 : vector<8x128xf32>
    %65 = vector.extract_strided_slice %63 {offsets = [0, 0], sizes = [8, 32], strides = [1, 1]} : vector<8x128xf32> to vector<8x32xf32>
    %66 = vector.extract_strided_slice %63 {offsets = [0, 32], sizes = [8, 32], strides = [1, 1]} : vector<8x128xf32> to vector<8x32xf32>
    %67 = vector.extract_strided_slice %64 {offsets = [0, 64], sizes = [8, 32], strides = [1, 1]} : vector<8x128xf32> to vector<8x32xf32>
    %68 = vector.extract_strided_slice %63 {offsets = [0, 96], sizes = [8, 32], strides = [1, 1]} : vector<8x128xf32> to vector<8x32xf32>
    %69 = arith.mulf %66, %47 : vector<8x32xf32>
    %70 = arith.mulf %65, %67 : vector<8x32xf32>
    %71 = arith.addf %69, %70 : vector<8x32xf32>
    %72 = math.tanh %71 : vector<8x32xf32>
    %73 = arith.mulf %68, %72 : vector<8x32xf32>
    %74 = arith.index_cast %c2_i32 : i32 to index
    %c0_22 = arith.constant 0 : index
    %c0_23 = arith.constant 0 : index
    %75 = vector.load %arg4[%74, %c0_22, %c0_23] : memref<8x8x32xf32, #tpu.memory_space<vmem>>, vector<1x8x32xf32>
    %76 = vector.shape_cast %75 : vector<1x8x32xf32> to vector<8x32xf32>
    %77 = vector.shape_cast %73 : vector<8x32xf32> to vector<1x8x32xf32>
    tpu.vector_store %arg4[%74, %c0_22, %c0_23], %77 {strides = array<i32>} : memref<8x8x32xf32, #tpu.memory_space<vmem>>, vector<1x8x32xf32>,
    %c3_i32 = arith.constant 3 : i32
    %78 = arith.index_cast %c3_i32 : i32 to index
    %c0_24 = arith.constant 0 : index
    %c0_25 = arith.constant 0 : index
    %79 = vector.load %arg2[%78, %c0_24, %c0_25] : memref<8x8x128xf32, #tpu.memory_space<vmem>>, vector<1x8x128xf32>
    %80 = vector.shape_cast %79 : vector<1x8x128xf32> to vector<8x128xf32>
    %cst_26 = arith.constant dense<0.000000e+00> : vector<8x128xf32>
    %81 = tpu.matmul %73, %3, %cst_26 {dimension_numbers = #tpu.dot_dimension_numbers<[1], [0], [0], [1], [0, 0, 1, 1], [], []>} : vector<8x32xf32>, vector<32x128xf32>, vector<8x128xf32> -> vector<8x128xf32>
    %82 = arith.addf %80, %81 : vector<8x128xf32>
    %83 = arith.negf %82 : vector<8x128xf32>
    %84 = math.exp %83 : vector<8x128xf32>
    %cst_27 = arith.constant 1.000000e+00 : f32
    %85 = vector.broadcast %cst_27 : f32 to vector<8x128xf32>
    %86 = arith.addf %85, %84 : vector<8x128xf32>
    %87 = arith.divf %85, %86 : vector<8x128xf32>
    %88 = math.tanh %82 : vector<8x128xf32>
    %89 = vector.extract_strided_slice %87 {offsets = [0, 0], sizes = [8, 32], strides = [1, 1]} : vector<8x128xf32> to vector<8x32xf32>
    %90 = vector.extract_strided_slice %87 {offsets = [0, 32], sizes = [8, 32], strides = [1, 1]} : vector<8x128xf32> to vector<8x32xf32>
    %91 = vector.extract_strided_slice %88 {offsets = [0, 64], sizes = [8, 32], strides = [1, 1]} : vector<8x128xf32> to vector<8x32xf32>
    %92 = vector.extract_strided_slice %87 {offsets = [0, 96], sizes = [8, 32], strides = [1, 1]} : vector<8x128xf32> to vector<8x32xf32>
    %93 = arith.mulf %90, %71 : vector<8x32xf32>
    %94 = arith.mulf %89, %91 : vector<8x32xf32>
    %95 = arith.addf %93, %94 : vector<8x32xf32>
    %96 = math.tanh %95 : vector<8x32xf32>
    %97 = arith.mulf %92, %96 : vector<8x32xf32>
    %98 = arith.index_cast %c3_i32 : i32 to index
    %c0_28 = arith.constant 0 : index
    %c0_29 = arith.constant 0 : index
    %99 = vector.load %arg4[%98, %c0_28, %c0_29] : memref<8x8x32xf32, #tpu.memory_space<vmem>>, vector<1x8x32xf32>
    %100 = vector.shape_cast %99 : vector<1x8x32xf32> to vector<8x32xf32>
    %101 = vector.shape_cast %97 : vector<8x32xf32> to vector<1x8x32xf32>
    tpu.vector_store %arg4[%98, %c0_28, %c0_29], %101 {strides = array<i32>} : memref<8x8x32xf32, #tpu.memory_space<vmem>>, vector<1x8x32xf32>,
    %c4_i32 = arith.constant 4 : i32
    %102 = arith.index_cast %c4_i32 : i32 to index
    %c0_30 = arith.constant 0 : index
    %c0_31 = arith.constant 0 : index
    %103 = vector.load %arg2[%102, %c0_30, %c0_31] : memref<8x8x128xf32, #tpu.memory_space<vmem>>, vector<1x8x128xf32>
    %104 = vector.shape_cast %103 : vector<1x8x128xf32> to vector<8x128xf32>
    %cst_32 = arith.constant dense<0.000000e+00> : vector<8x128xf32>
    %105 = tpu.matmul %97, %3, %cst_32 {dimension_numbers = #tpu.dot_dimension_numbers<[1], [0], [0], [1], [0, 0, 1, 1], [], []>} : vector<8x32xf32>, vector<32x128xf32>, vector<8x128xf32> -> vector<8x128xf32>
    %106 = arith.addf %104, %105 : vector<8x128xf32>
    %107 = arith.negf %106 : vector<8x128xf32>
    %108 = math.exp %107 : vector<8x128xf32>
    %cst_33 = arith.constant 1.000000e+00 : f32
    %109 = vector.broadcast %cst_33 : f32 to vector<8x128xf32>
    %110 = arith.addf %109, %108 : vector<8x128xf32>
    %111 = arith.divf %109, %110 : vector<8x128xf32>
    %112 = math.tanh %106 : vector<8x128xf32>
    %113 = vector.extract_strided_slice %111 {offsets = [0, 0], sizes = [8, 32], strides = [1, 1]} : vector<8x128xf32> to vector<8x32xf32>
    %114 = vector.extract_strided_slice %111 {offsets = [0, 32], sizes = [8, 32], strides = [1, 1]} : vector<8x128xf32> to vector<8x32xf32>
    %115 = vector.extract_strided_slice %112 {offsets = [0, 64], sizes = [8, 32], strides = [1, 1]} : vector<8x128xf32> to vector<8x32xf32>
    %116 = vector.extract_strided_slice %111 {offsets = [0, 96], sizes = [8, 32], strides = [1, 1]} : vector<8x128xf32> to vector<8x32xf32>
    %117 = arith.mulf %114, %95 : vector<8x32xf32>
    %118 = arith.mulf %113, %115 : vector<8x32xf32>
    %119 = arith.addf %117, %118 : vector<8x32xf32>
    %120 = math.tanh %119 : vector<8x32xf32>
    %121 = arith.mulf %116, %120 : vector<8x32xf32>
    %122 = arith.index_cast %c4_i32 : i32 to index
    %c0_34 = arith.constant 0 : index
    %c0_35 = arith.constant 0 : index
    %123 = vector.load %arg4[%122, %c0_34, %c0_35] : memref<8x8x32xf32, #tpu.memory_space<vmem>>, vector<1x8x32xf32>
    %124 = vector.shape_cast %123 : vector<1x8x32xf32> to vector<8x32xf32>
    %125 = vector.shape_cast %121 : vector<8x32xf32> to vector<1x8x32xf32>
    tpu.vector_store %arg4[%122, %c0_34, %c0_35], %125 {strides = array<i32>} : memref<8x8x32xf32, #tpu.memory_space<vmem>>, vector<1x8x32xf32>,
    %c5_i32 = arith.constant 5 : i32
    %126 = arith.index_cast %c5_i32 : i32 to index
    %c0_36 = arith.constant 0 : index
    %c0_37 = arith.constant 0 : index
    %127 = vector.load %arg2[%126, %c0_36, %c0_37] : memref<8x8x128xf32, #tpu.memory_space<vmem>>, vector<1x8x128xf32>
    %128 = vector.shape_cast %127 : vector<1x8x128xf32> to vector<8x128xf32>
    %cst_38 = arith.constant dense<0.000000e+00> : vector<8x128xf32>
    %129 = tpu.matmul %121, %3, %cst_38 {dimension_numbers = #tpu.dot_dimension_numbers<[1], [0], [0], [1], [0, 0, 1, 1], [], []>} : vector<8x32xf32>, vector<32x128xf32>, vector<8x128xf32> -> vector<8x128xf32>
    %130 = arith.addf %128, %129 : vector<8x128xf32>
    %131 = arith.negf %130 : vector<8x128xf32>
    %132 = math.exp %131 : vector<8x128xf32>
    %cst_39 = arith.constant 1.000000e+00 : f32
    %133 = vector.broadcast %cst_39 : f32 to vector<8x128xf32>
    %134 = arith.addf %133, %132 : vector<8x128xf32>
    %135 = arith.divf %133, %134 : vector<8x128xf32>
    %136 = math.tanh %130 : vector<8x128xf32>
    %137 = vector.extract_strided_slice %135 {offsets = [0, 0], sizes = [8, 32], strides = [1, 1]} : vector<8x128xf32> to vector<8x32xf32>
    %138 = vector.extract_strided_slice %135 {offsets = [0, 32], sizes = [8, 32], strides = [1, 1]} : vector<8x128xf32> to vector<8x32xf32>
    %139 = vector.extract_strided_slice %136 {offsets = [0, 64], sizes = [8, 32], strides = [1, 1]} : vector<8x128xf32> to vector<8x32xf32>
    %140 = vector.extract_strided_slice %135 {offsets = [0, 96], sizes = [8, 32], strides = [1, 1]} : vector<8x128xf32> to vector<8x32xf32>
    %141 = arith.mulf %138, %119 : vector<8x32xf32>
    %142 = arith.mulf %137, %139 : vector<8x32xf32>
    %143 = arith.addf %141, %142 : vector<8x32xf32>
    %144 = math.tanh %143 : vector<8x32xf32>
    %145 = arith.mulf %140, %144 : vector<8x32xf32>
    %146 = arith.index_cast %c5_i32 : i32 to index
    %c0_40 = arith.constant 0 : index
    %c0_41 = arith.constant 0 : index
    %147 = vector.load %arg4[%146, %c0_40, %c0_41] : memref<8x8x32xf32, #tpu.memory_space<vmem>>, vector<1x8x32xf32>
    %148 = vector.shape_cast %147 : vector<1x8x32xf32> to vector<8x32xf32>
    %149 = vector.shape_cast %145 : vector<8x32xf32> to vector<1x8x32xf32>
    tpu.vector_store %arg4[%146, %c0_40, %c0_41], %149 {strides = array<i32>} : memref<8x8x32xf32, #tpu.memory_space<vmem>>, vector<1x8x32xf32>,
    %c6_i32 = arith.constant 6 : i32
    %150 = arith.index_cast %c6_i32 : i32 to index
    %c0_42 = arith.constant 0 : index
    %c0_43 = arith.constant 0 : index
    %151 = vector.load %arg2[%150, %c0_42, %c0_43] : memref<8x8x128xf32, #tpu.memory_space<vmem>>, vector<1x8x128xf32>
    %152 = vector.shape_cast %151 : vector<1x8x128xf32> to vector<8x128xf32>
    %cst_44 = arith.constant dense<0.000000e+00> : vector<8x128xf32>
    %153 = tpu.matmul %145, %3, %cst_44 {dimension_numbers = #tpu.dot_dimension_numbers<[1], [0], [0], [1], [0, 0, 1, 1], [], []>} : vector<8x32xf32>, vector<32x128xf32>, vector<8x128xf32> -> vector<8x128xf32>
    %154 = arith.addf %152, %153 : vector<8x128xf32>
    %155 = arith.negf %154 : vector<8x128xf32>
    %156 = math.exp %155 : vector<8x128xf32>
    %cst_45 = arith.constant 1.000000e+00 : f32
    %157 = vector.broadcast %cst_45 : f32 to vector<8x128xf32>
    %158 = arith.addf %157, %156 : vector<8x128xf32>
    %159 = arith.divf %157, %158 : vector<8x128xf32>
    %160 = math.tanh %154 : vector<8x128xf32>
    %161 = vector.extract_strided_slice %159 {offsets = [0, 0], sizes = [8, 32], strides = [1, 1]} : vector<8x128xf32> to vector<8x32xf32>
    %162 = vector.extract_strided_slice %159 {offsets = [0, 32], sizes = [8, 32], strides = [1, 1]} : vector<8x128xf32> to vector<8x32xf32>
    %163 = vector.extract_strided_slice %160 {offsets = [0, 64], sizes = [8, 32], strides = [1, 1]} : vector<8x128xf32> to vector<8x32xf32>
    %164 = vector.extract_strided_slice %159 {offsets = [0, 96], sizes = [8, 32], strides = [1, 1]} : vector<8x128xf32> to vector<8x32xf32>
    %165 = arith.mulf %162, %143 : vector<8x32xf32>
    %166 = arith.mulf %161, %163 : vector<8x32xf32>
    %167 = arith.addf %165, %166 : vector<8x32xf32>
    %168 = math.tanh %167 : vector<8x32xf32>
    %169 = arith.mulf %164, %168 : vector<8x32xf32>
    %170 = arith.index_cast %c6_i32 : i32 to index
    %c0_46 = arith.constant 0 : index
    %c0_47 = arith.constant 0 : index
    %171 = vector.load %arg4[%170, %c0_46, %c0_47] : memref<8x8x32xf32, #tpu.memory_space<vmem>>, vector<1x8x32xf32>
    %172 = vector.shape_cast %171 : vector<1x8x32xf32> to vector<8x32xf32>
    %173 = vector.shape_cast %169 : vector<8x32xf32> to vector<1x8x32xf32>
    tpu.vector_store %arg4[%170, %c0_46, %c0_47], %173 {strides = array<i32>} : memref<8x8x32xf32, #tpu.memory_space<vmem>>, vector<1x8x32xf32>,
    %c7_i32 = arith.constant 7 : i32
    %174 = arith.index_cast %c7_i32 : i32 to index
    %c0_48 = arith.constant 0 : index
    %c0_49 = arith.constant 0 : index
    %175 = vector.load %arg2[%174, %c0_48, %c0_49] : memref<8x8x128xf32, #tpu.memory_space<vmem>>, vector<1x8x128xf32>
    %176 = vector.shape_cast %175 : vector<1x8x128xf32> to vector<8x128xf32>
    %cst_50 = arith.constant dense<0.000000e+00> : vector<8x128xf32>
    %177 = tpu.matmul %169, %3, %cst_50 {dimension_numbers = #tpu.dot_dimension_numbers<[1], [0], [0], [1], [0, 0, 1, 1], [], []>} : vector<8x32xf32>, vector<32x128xf32>, vector<8x128xf32> -> vector<8x128xf32>
    %178 = arith.addf %176, %177 : vector<8x128xf32>
    %179 = arith.negf %178 : vector<8x128xf32>
    %180 = math.exp %179 : vector<8x128xf32>
    %cst_51 = arith.constant 1.000000e+00 : f32
    %181 = vector.broadcast %cst_51 : f32 to vector<8x128xf32>
    %182 = arith.addf %181, %180 : vector<8x128xf32>
    %183 = arith.divf %181, %182 : vector<8x128xf32>
    %184 = math.tanh %178 : vector<8x128xf32>
    %185 = vector.extract_strided_slice %183 {offsets = [0, 0], sizes = [8, 32], strides = [1, 1]} : vector<8x128xf32> to vector<8x32xf32>
    %186 = vector.extract_strided_slice %183 {offsets = [0, 32], sizes = [8, 32], strides = [1, 1]} : vector<8x128xf32> to vector<8x32xf32>
    %187 = vector.extract_strided_slice %184 {offsets = [0, 64], sizes = [8, 32], strides = [1, 1]} : vector<8x128xf32> to vector<8x32xf32>
    %188 = vector.extract_strided_slice %183 {offsets = [0, 96], sizes = [8, 32], strides = [1, 1]} : vector<8x128xf32> to vector<8x32xf32>
    %189 = arith.mulf %186, %167 : vector<8x32xf32>
    %190 = arith.mulf %185, %187 : vector<8x32xf32>
    %191 = arith.addf %189, %190 : vector<8x32xf32>
    %192 = math.tanh %191 : vector<8x32xf32>
    %193 = arith.mulf %188, %192 : vector<8x32xf32>
    %194 = arith.index_cast %c7_i32 : i32 to index
    %c0_52 = arith.constant 0 : index
    %c0_53 = arith.constant 0 : index
    %195 = vector.load %arg4[%194, %c0_52, %c0_53] : memref<8x8x32xf32, #tpu.memory_space<vmem>>, vector<1x8x32xf32>
    %196 = vector.shape_cast %195 : vector<1x8x32xf32> to vector<8x32xf32>
    %197 = vector.shape_cast %193 : vector<8x32xf32> to vector<1x8x32xf32>
    tpu.vector_store %arg4[%194, %c0_52, %c0_53], %197 {strides = array<i32>} : memref<8x8x32xf32, #tpu.memory_space<vmem>>, vector<1x8x32xf32>,
    %c8_i32 = arith.constant 8 : i32
    %c0_54 = arith.constant 0 : index
    %c0_55 = arith.constant 0 : index
    %198 = vector.load %arg5[%c0_54, %c0_55] : memref<8x32xf32, #tpu.memory_space<vmem>>, vector<8x32xf32>
    tpu.vector_store %arg5[%c0_54, %c0_55], %193 {strides = array<i32>} : memref<8x32xf32, #tpu.memory_space<vmem>>, vector<8x32xf32>,
    %c0_56 = arith.constant 0 : index
    %c0_57 = arith.constant 0 : index
    %199 = vector.load %arg6[%c0_56, %c0_57] : memref<8x32xf32, #tpu.memory_space<vmem>>, vector<8x32xf32>
    tpu.vector_store %arg6[%c0_56, %c0_57], %191 {strides = array<i32>} : memref<8x32xf32, #tpu.memory_space<vmem>>, vector<8x32xf32>,
    return
  }
  func.func @transform_0(%arg0: i32, %arg1: i32) -> (i32, i32, i32) {
    %c0_i32 = arith.constant 0 : i32
    %c0_i32_0 = arith.constant 0 : i32
    return %arg1, %arg0, %c0_i32 : i32, i32, i32
  }
  func.func @transform_1(%arg0: i32, %arg1: i32) -> (i32, i32) {
    %c0_i32 = arith.constant 0 : i32
    %c0_i32_0 = arith.constant 0 : i32
    %c0_i32_1 = arith.constant 0 : i32
    return %c0_i32, %c0_i32_0 : i32, i32
  }
  func.func @transform_2(%arg0: i32, %arg1: i32) -> (i32, i32, i32) {
    %c0_i32 = arith.constant 0 : i32
    %c0_i32_0 = arith.constant 0 : i32
    return %arg1, %arg0, %c0_i32 : i32, i32, i32
  }
}

</mosaic_0001>

<bundles_post_ra>
// kernel: tpu_custom_call.1
= control target key start
LH: loop header
LB: loop body
LE: loop exit
PB: predicated region body
PF: predicated region fallthrough
CT: control target
= control target key end

     0   :  { %7 = vsyncpa [#allocation5], 0  ;;  %s1438_s0 = inlined_call_operand.hbm [shape: f32[8,8,128], index: 0, kind: input, shape index: {}]   ;;  %s1439_s1 = inlined_call_operand.hbm [shape: f32[32,128], index: 1, kind: input, shape index: {}]   ;;  %s1440_s2 = inlined_call_operand.hbm [shape: f32[8,8,32], index: 2, kind: output, shape index: {}]  }
   0x1   :  { %8 = vsyncpa [#allocation8], 0 }
   0x2   :  { %9 = vsyncpa [#allocation6], 0  ;;  %s1260_s9 = smov [#allocation4]   ;;  %s1188_s13 = scalar_lea.hbm %s1438_s0, 1024 }
   0x3   :  { %s15_s10 = sshll.u32 %s1260_s9, 4  ;;  %p1189_p0 = scmp.ne.s32.totalorder %s1438_s0, %s1188_s13  ;;  %s16_s10 = int_to_ptr.vmem [resolvable:$true] %s15_s10 }
   0x4   :  { %p1192_p1 = scmp.lt.u32.totalorder %s1188_s13, %s1438_s0 }
   0x6   :  { %p1194_p2 = pnand %p1192_p1, %p1189_p0 }
   0x8   :  { %1197 = shalt.err (!%p1194_p2)
}
   0x9   :  { %s1198_s18 = scalar_lea.vmem %s16_s10, 1024  ;;  %p1203_p4 = scmp.lt.s32.totalorder %s16_s10, %s16_s10 }
   0xa   :  { %p1199_p3 = scmp.ne.s32.totalorder %s16_s10, %s1198_s18  ;;  %p1204_p5 = scmp.lt.s32.totalorder %s1198_s18, %s1198_s18 }
   0xc   :  { %p1205_p6 = por %p1204_p5, %p1203_p4 }
   0xe   :  { %p1206_p7 = pnand %p1205_p6, %p1199_p3 }
  0x10   :  { %1209 = shalt.err (!%p1206_p7)
}
  0x11   :  { %s1261_s19 = smov 128   ;;  %s1262_s20 = smov 8  }
  0x12   :  { %21 = dma.hbm_to_vmem [thread:$0]  %s1438_s0, 1024, %s16_s10, [#allocation5], %s1261_s19, %s1261_s19, %s1262_s20  }
  0x13   :  { %s1263_s23 = smov [#allocation7]   ;;  %s1210_s27 = scalar_lea.hbm %s1439_s1, 512 }
  0x14   :  { %s27_s24 = sshll.u32 %s1263_s23, 4  ;;  %p1211_p8 = scmp.ne.s32.totalorder %s1439_s1, %s1210_s27  ;;  %s28_s24 = int_to_ptr.vmem [resolvable:$true] %s27_s24 }
  0x15   :  { %p1214_p9 = scmp.lt.u32.totalorder %s1210_s27, %s1439_s1 }
  0x17   :  { %p1216_p10 = pnand %p1214_p9, %p1211_p8 }
  0x19   :  { %1219 = shalt.err (!%p1216_p10)
}
  0x1a   :  { %s1220_s4 = scalar_lea.vmem %s28_s24, 512  ;;  %p1225_p12 = scmp.lt.s32.totalorder %s28_s24, %s28_s24 }
  0x1b   :  { %p1221_p11 = scmp.ne.s32.totalorder %s28_s24, %s1220_s4  ;;  %p1226_p13 = scmp.lt.s32.totalorder %s1220_s4, %s1220_s4 }
  0x1d   :  { %p1227_p0 = por %p1226_p13, %p1225_p12 }
  0x1f   :  { %p1228_p1 = pnand %p1227_p0, %p1221_p11 }
  0x21   :  { %1231 = shalt.err (!%p1228_p1)
}
  0x22   :  { %33 = dma.hbm_to_vmem [thread:$0]  %s1439_s1, 512, %s28_s24, [#allocation8], %s1261_s19, %s1261_s19, %s1262_s20  }
  0x23   :  { %1254 = dma.done.wait [#allocation5], 1024  }
  0x24   :  { %1255 = vsyncadd [#allocation5], 4294966272 }
  0x25   :  { %1256 = dma.done.wait [#allocation8], 512  }
  0x26   :  { %1257 = vsyncadd [#allocation8], 4294966784  ;;  %vm44_vm0 = vcmask 261120   ;;  %v1264_v0 = vmov 0.0|0.0   ;;  %vm1265_vm1 = vmmov 0   ;;  %v1266_v1 = vmov 0.0  }
  0x27   :  { %1065 = vmatprep.subr.bf16.mxu0 %v1264_v0  ;;  %985 = vmatprep.mubr.msk.f32.mxu0 %vm1265_vm1, %v1266_v1  ;;  %45 = vst.msk [vmem:[#allocation2] sm:$0xff] %vm44_vm0, %v1266_v1  ;;  %46 = vst.msk [vmem:[#allocation3] sm:$0xff] %vm44_vm0, %v1266_v1  ;;  %v47_v2 = vld [vmem:[#allocation7] sm:$0xff]  ;;  %v48_v3 = vld [vmem:[#allocation7 + $0x8] sm:$0xff]  ;;  %s1267_s1 = smov 64   ;;  %s1268_s6 = smov 32  }
  0x28   :  { %1071 = vmatprep.subr.bf16.mxu1 %v1264_v0  ;;  %996 = vmatprep.mubr.msk.f32.mxu1 %vm1265_vm1, %v1266_v1  ;;  %v49_v4 = vld [vmem:[#allocation7 + $0x10] sm:$0xff]  ;;  %v1326_v5 = vpack.c.bf16 %v48_v3, %v47_v2  ;;  %v50_v6 = vld [vmem:[#allocation7 + $0x18] sm:$0xff]  ;;  %v53_v9 = vld [vmem:[#allocation4] sm:$0xff]  ;;  %s1269_s7 = smov 96   ;;  %s1270_s8 = smov [#allocation9]  }
  0x29   :  { %v1329_v7 = vpack.c.bf16 %v50_v6, %v49_v4  ;;  %v163_v29 = vld [vmem:[#allocation4 + $0x8] sm:$0xff]  ;;  %v268_v47 = vld [vmem:[#allocation4 + $0x10] sm:$0xff]  ;;  %v373_v3 = vld [vmem:[#allocation4 + $0x18] sm:$0xff]  ;;  %s908_s9 = sshll.u32 %s1270_s8, 4  ;;  %s909_s9 = int_to_ptr.vmem [resolvable:$true] %s908_s9 }
  0x2a   :  { %1067 = vmatpush3.bf16.msra.mxu0 %v1326_v5  ;;  %1073 = vmatpush3.bf16.msra.mxu1 %v1326_v5  ;;  %s1232_s10 = scalar_lea.vmem %s909_s9, 1024  ;;  %p1237_p3 = scmp.lt.s32.totalorder %s909_s9, %s909_s9 }
  0x2b   :  { %1068 = vmatprep.subr.bf16.mxu0 %v1264_v0  ;;  %1074 = vmatprep.subr.bf16.mxu1 %v1264_v0  ;;  %p1233_p2 = scmp.ne.s32.totalorder %s909_s9, %s1232_s10  ;;  %p1238_p4 = scmp.lt.s32.totalorder %s1232_s10, %s1232_s10 }
  0x2d   :  { %p1239_p5 = por %p1238_p4, %p1237_p3 }
  0x2e   :  { %1070 = vmatpush3.bf16.msra.mxu0 %v1329_v7  ;;  %v51_v8 = vld [vmem:[#allocation2] sm:$0xff]  ;;  %1076 = vmatpush3.bf16.msra.mxu1 %v1329_v7  ;;  %v52_v14 = vld [vmem:[#allocation3] sm:$0xff] }
  0x2f   :  { %1077 = vmatprep.subr.bf16.mxu0 %v1264_v0  ;;  %1083 = vmatprep.subr.bf16.mxu1 %v1264_v0  ;;  %p1240_p6 = pnand %p1239_p5, %p1233_p2 }
  0x31   :  { %986 = vmatmul.mubr.msk.f32.vlgmr.msra.gmra.mrb[0].mxu0 %vm44_vm0, %v51_v8 }
  0x32   :  { %1079 = vmatpush3.bf16.msra.mxu0 %v1326_v5  ;;  %1007 = vmatprep.mubr.msk.f32.mxu0 %vm1265_vm1, %v1266_v1 }
  0x33   :  { %1080 = vmatprep.subr.bf16.mxu0 %v1264_v0 }
  0x36   :  { %1082 = vmatpush3.bf16.msra.mxu0 %v1329_v7 }
  0x37   :  { %1089 = vmatprep.subr.bf16.mxu0 %v1264_v0 }
 0x104   :  { %v124_v10 = vpop.f32.mrb[0].mxu0 }
 0x105   :  { %v128_v11 = vadd.f32 %v124_v10, %v53_v9  ;;  %v987_v12 = vpop.f32.mrb[1].mxu0 }
 0x107   :  { %1124 = vtanh.f32 %v128_v11  ;;  %v922_v15 = vmul.f32 -1.442695, %v128_v11 }
 0x109   :  { %1126 = vpow2.f32 %v922_v15 }
 0x111   :  { %v1125_v13 = vpop.eup %1124 }
 0x112   :  { %142 = vrot.lane.b32.xlu0 %v1125_v13, %s1267_s1 }
 0x113   :  { %v1127_v16 = vpop.eup %1126 }
 0x114   :  { %v132_v17 = vadd.f32 1.0, %v1127_v16 }
 0x116   :  { %137 = vrot.lane.b32.xlu0 %v52_v14, %s1268_s6  ;;  %1128 = vrcp.f32 %v132_v17 }
 0x120   :  { %v1129_v18 = vpop.eup %1128 }
 0x184   :  { %v143_v19 = vpop.permute.xlu0 %142 }
 0x185   :  { %v145_v20 = vmul.f32 %v1129_v18, %v143_v19 }
 0x187   :  { %147 = vrot.lane.b32.xlu1 %v145_v20, %s1268_s6 }
 0x188   :  { %v138_v21 = vpop.permute.xlu0 %137 }
 0x189   :  { %v140_v22 = vmul.f32 %v1129_v18, %v138_v21 }
 0x1f9   :  { %v148_v23 = vpop.permute.xlu1 %147 }
 0x1fa   :  { %v150_v24 = vadd.f32 %v148_v23, %v140_v22  ;;  %v478_v23 = vld [vmem:[#allocation4 + $0x20] sm:$0xff] }
 0x1fc   :  { %1130 = vtanh.f32 %v150_v24 }
 0x206   :  { %v1131_v25 = vpop.eup %1130 }
 0x207   :  { %153 = vrot.lane.b32.xlu1 %v1131_v25, %s1267_s1 }
 0x279   :  { %v154_v26 = vpop.permute.xlu1 %153 }
 0x27a   :  { %v156_v27 = vmul.f32 %v1129_v18, %v154_v26 }
 0x27c   :  { %158 = vrot.lane.b32.xlu0 %v156_v27, %s1268_s6 }
 0x2ee   :  { %v159_v28 = vpop.permute.xlu0 %158 }
 0x2ef   :  { %161 = vst.msk [vmem:[#allocation9] sm:$0xff] %vm44_vm0, %v159_v28  ;;  %997 = vmatmul.mubr.msk.f32.vlgmr.msra.gmra.mrb[0].mxu1 %vm44_vm0, %v159_v28 }
 0x2f0   :  { %1085 = vmatpush3.bf16.msra.mxu1 %v1326_v5  ;;  %1018 = vmatprep.mubr.msk.f32.mxu1 %vm1265_vm1, %v1266_v1 }
 0x2f1   :  { %1086 = vmatprep.subr.bf16.mxu1 %v1264_v0 }
 0x2f4   :  { %1088 = vmatpush3.bf16.msra.mxu1 %v1329_v7 }
 0x2f5   :  { %1095 = vmatprep.subr.bf16.mxu1 %v1264_v0 }
 0x3c2   :  { %v232_v30 = vpop.f32.mrb[0].mxu1 }
 0x3c3   :  { %v236_v31 = vadd.f32 %v232_v30, %v163_v29  ;;  %v998_v32 = vpop.f32.mrb[1].mxu1 }
 0x3c5   :  { %1132 = vtanh.f32 %v236_v31  ;;  %v924_v34 = vmul.f32 -1.442695, %v236_v31 }
 0x3c7   :  { %1134 = vpow2.f32 %v924_v34 }
 0x3cf   :  { %v1133_v33 = vpop.eup %1132 }
 0x3d0   :  { %246 = vrot.lane.b32.xlu1 %v1133_v33, %s1267_s1 }
 0x3d1   :  { %v1135_v35 = vpop.eup %1134 }
 0x3d2   :  { %v240_v36 = vadd.f32 1.0, %v1135_v35 }
 0x3d4   :  { %1136 = vrcp.f32 %v240_v36 }
 0x3de   :  { %v1137_v37 = vpop.eup %1136 }
 0x3df   :  { %v244_v40 = vmul.f32 %v1137_v37, %v150_v24 }
 0x442   :  { %v247_v38 = vpop.permute.xlu1 %246 }
 0x443   :  { %v249_v39 = vmul.f32 %v1137_v37, %v247_v38 }
 0x445   :  { %251 = vrot.lane.b32.xlu0 %v249_v39, %s1268_s6 }
 0x4b7   :  { %v252_v41 = vpop.permute.xlu0 %251 }
 0x4b8   :  { %v254_v42 = vadd.f32 %v252_v41, %v244_v40  ;;  %v583_v41 = vld [vmem:[#allocation4 + $0x28] sm:$0xff] }
 0x4ba   :  { %1138 = vtanh.f32 %v254_v42 }
 0x4c4   :  { %v1139_v43 = vpop.eup %1138 }
 0x4c5   :  { %257 = vrot.lane.b32.xlu1 %v1139_v43, %s1267_s1 }
 0x537   :  { %v258_v44 = vpop.permute.xlu1 %257 }
 0x538   :  { %v260_v45 = vmul.f32 %v1137_v37, %v258_v44 }
 0x53a   :  { %262 = vrot.lane.b32.xlu0 %v260_v45, %s1268_s6 }
 0x5ac   :  { %v263_v46 = vpop.permute.xlu0 %262 }
 0x5ad   :  { %266 = vst.msk [vmem:[#allocation9 + $0x8] sm:$0xff] %vm44_vm0, %v263_v46  ;;  %1008 = vmatmul.mubr.msk.f32.vlgmr.msra.gmra.mrb[2].mxu0 %vm44_vm0, %v263_v46 }
 0x5ae   :  { %1091 = vmatpush3.bf16.msra.mxu0 %v1326_v5  ;;  %1029 = vmatprep.mubr.msk.f32.mxu0 %vm1265_vm1, %v1266_v1 }
 0x5af   :  { %1092 = vmatprep.subr.bf16.mxu0 %v1264_v0 }
 0x5b2   :  { %1094 = vmatpush3.bf16.msra.mxu0 %v1329_v7 }
 0x5b3   :  { %1101 = vmatprep.subr.bf16.mxu0 %v1264_v0 }
 0x680   :  { %v337_v48 = vpop.f32.mrb[2].mxu0 }
 0x681   :  { %v341_v49 = vadd.f32 %v337_v48, %v268_v47  ;;  %v1009_v50 = vpop.f32.mrb[3].mxu0 }
 0x683   :  { %1140 = vtanh.f32 %v341_v49  ;;  %v926_v52 = vmul.f32 -1.442695, %v341_v49 }
 0x685   :  { %1142 = vpow2.f32 %v926_v52 }
 0x68d   :  { %v1141_v51 = vpop.eup %1140 }
 0x68e   :  { %351 = vrot.lane.b32.xlu1 %v1141_v51, %s1267_s1 }
 0x68f   :  { %v1143_v53 = vpop.eup %1142 }
 0x690   :  { %v345_v54 = vadd.f32 1.0, %v1143_v53 }
 0x692   :  { %1144 = vrcp.f32 %v345_v54 }
 0x69c   :  { %v1145_v55 = vpop.eup %1144 }
 0x69d   :  { %v349_v58 = vmul.f32 %v1145_v55, %v254_v42 }
 0x700   :  { %v352_v56 = vpop.permute.xlu1 %351 }
 0x701   :  { %v354_v57 = vmul.f32 %v1145_v55, %v352_v56 }
 0x703   :  { %356 = vrot.lane.b32.xlu0 %v354_v57, %s1268_s6 }
 0x775   :  { %v357_v59 = vpop.permute.xlu0 %356 }
 0x776   :  { %v359_v60 = vadd.f32 %v357_v59, %v349_v58 }
 0x778   :  { %1146 = vtanh.f32 %v359_v60 }
 0x782   :  { %v1147_v61 = vpop.eup %1146 }
 0x783   :  { %362 = vrot.lane.b32.xlu1 %v1147_v61, %s1267_s1 }
 0x7f5   :  { %v363_v62 = vpop.permute.xlu1 %362 }
 0x7f6   :  { %v365_v63 = vmul.f32 %v1145_v55, %v363_v62  ;;  %v688_v55 = vld [vmem:[#allocation4 + $0x30] sm:$0xff] }
 0x7f8   :  { %367 = vrot.lane.b32.xlu0 %v365_v63, %s1268_s6 }
 0x86a   :  { %v368_v2 = vpop.permute.xlu0 %367 }
 0x86b   :  { %371 = vst.msk [vmem:[#allocation9 + $0x10] sm:$0xff] %vm44_vm0, %v368_v2  ;;  %1019 = vmatmul.mubr.msk.f32.vlgmr.msra.gmra.mrb[2].mxu1 %vm44_vm0, %v368_v2 }
 0x86c   :  { %1097 = vmatpush3.bf16.msra.mxu1 %v1326_v5  ;;  %1040 = vmatprep.mubr.msk.f32.mxu1 %vm1265_vm1, %v1266_v1 }
 0x86d   :  { %1098 = vmatprep.subr.bf16.mxu1 %v1264_v0 }
 0x870   :  { %1100 = vmatpush3.bf16.msra.mxu1 %v1329_v7 }
 0x871   :  { %1107 = vmatprep.subr.bf16.mxu1 %v1264_v0 }
 0x93e   :  { %v442_v4 = vpop.f32.mrb[2].mxu1 }
 0x93f   :  { %v446_v6 = vadd.f32 %v442_v4, %v373_v3  ;;  %v1020_v8 = vpop.f32.mrb[3].mxu1 }
 0x941   :  { %1148 = vtanh.f32 %v446_v6  ;;  %v928_v10 = vmul.f32 -1.442695, %v446_v6 }
 0x943   :  { %1150 = vpow2.f32 %v928_v10 }
 0x94b   :  { %v1149_v9 = vpop.eup %1148 }
 0x94c   :  { %456 = vrot.lane.b32.xlu1 %v1149_v9, %s1267_s1 }
 0x94d   :  { %v1151_v11 = vpop.eup %1150 }
 0x94e   :  { %v450_v12 = vadd.f32 1.0, %v1151_v11 }
 0x950   :  { %1152 = vrcp.f32 %v450_v12 }
 0x95a   :  { %v1153_v13 = vpop.eup %1152 }
 0x95b   :  { %v454_v16 = vmul.f32 %v1153_v13, %v359_v60 }
 0x9be   :  { %v457_v14 = vpop.permute.xlu1 %456 }
 0x9bf   :  { %v459_v15 = vmul.f32 %v1153_v13, %v457_v14 }
 0x9c1   :  { %461 = vrot.lane.b32.xlu0 %v459_v15, %s1268_s6 }
 0xa33   :  { %v462_v17 = vpop.permute.xlu0 %461 }
 0xa34   :  { %v464_v18 = vadd.f32 %v462_v17, %v454_v16 }
 0xa36   :  { %1154 = vtanh.f32 %v464_v18 }
 0xa40   :  { %v1155_v19 = vpop.eup %1154 }
 0xa41   :  { %467 = vrot.lane.b32.xlu1 %v1155_v19, %s1267_s1 }
 0xab3   :  { %v468_v20 = vpop.permute.xlu1 %467 }
 0xab4   :  { %v470_v21 = vmul.f32 %v1153_v13, %v468_v20  ;;  %v793_v13 = vld [vmem:[#allocation4 + $0x38] sm:$0xff] }
 0xab6   :  { %472 = vrot.lane.b32.xlu0 %v470_v21, %s1268_s6 }
 0xb28   :  { %v473_v22 = vpop.permute.xlu0 %472 }
 0xb29   :  { %476 = vst.msk [vmem:[#allocation9 + $0x18] sm:$0xff] %vm44_vm0, %v473_v22  ;;  %1030 = vmatmul.mubr.msk.f32.vlgmr.msra.gmra.mrb[4].mxu0 %vm44_vm0, %v473_v22 }
 0xb2a   :  { %1103 = vmatpush3.bf16.msra.mxu0 %v1326_v5  ;;  %1051 = vmatprep.mubr.msk.f32.mxu0 %vm1265_vm1, %v1266_v1 }
 0xb2b   :  { %1104 = vmatprep.subr.bf16.mxu0 %v1264_v0 }
 0xb2e   :  { %1106 = vmatpush3.bf16.msra.mxu0 %v1329_v7 }
 0xbfc   :  { %v547_v24 = vpop.f32.mrb[4].mxu0 }
 0xbfd   :  { %v551_v25 = vadd.f32 %v547_v24, %v478_v23  ;;  %v1031_v26 = vpop.f32.mrb[5].mxu0 }
 0xbff   :  { %1156 = vtanh.f32 %v551_v25  ;;  %v930_v28 = vmul.f32 -1.442695, %v551_v25 }
 0xc01   :  { %1158 = vpow2.f32 %v930_v28 }
 0xc09   :  { %v1157_v27 = vpop.eup %1156 }
 0xc0a   :  { %561 = vrot.lane.b32.xlu1 %v1157_v27, %s1267_s1 }
 0xc0b   :  { %v1159_v29 = vpop.eup %1158 }
 0xc0c   :  { %v555_v30 = vadd.f32 1.0, %v1159_v29 }
 0xc0e   :  { %1160 = vrcp.f32 %v555_v30 }
 0xc18   :  { %v1161_v31 = vpop.eup %1160 }
 0xc19   :  { %v559_v34 = vmul.f32 %v1161_v31, %v464_v18 }
 0xc7c   :  { %v562_v32 = vpop.permute.xlu1 %561 }
 0xc7d   :  { %v564_v33 = vmul.f32 %v1161_v31, %v562_v32 }
 0xc7f   :  { %566 = vrot.lane.b32.xlu0 %v564_v33, %s1268_s6 }
 0xcf1   :  { %v567_v35 = vpop.permute.xlu0 %566 }
 0xcf2   :  { %v569_v36 = vadd.f32 %v567_v35, %v559_v34 }
 0xcf4   :  { %1162 = vtanh.f32 %v569_v36 }
 0xcfe   :  { %v1163_v37 = vpop.eup %1162 }
 0xcff   :  { %572 = vrot.lane.b32.xlu1 %v1163_v37, %s1267_s1 }
 0xd71   :  { %v573_v38 = vpop.permute.xlu1 %572 }
 0xd72   :  { %v575_v39 = vmul.f32 %v1161_v31, %v573_v38 }
 0xd74   :  { %577 = vrot.lane.b32.xlu0 %v575_v39, %s1268_s6 }
 0xde6   :  { %v578_v40 = vpop.permute.xlu0 %577 }
 0xde7   :  { %581 = vst.msk [vmem:[#allocation9 + $0x20] sm:$0xff] %vm44_vm0, %v578_v40  ;;  %1041 = vmatmul.mubr.msk.f32.vlgmr.msra.gmra.mrb[4].mxu1 %vm44_vm0, %v578_v40 }
 0xde8   :  { %1109 = vmatpush3.bf16.msra.mxu1 %v1326_v5  ;;  %1062 = vmatprep.mubr.msk.f32.mxu1 %vm1265_vm1, %v1266_v1 }
 0xde9   :  { %1110 = vmatprep.subr.bf16.mxu1 %v1264_v0 }
 0xdec   :  { %1112 = vmatpush3.bf16.msra.mxu1 %v1329_v7 }
 0xeba   :  { %v652_v42 = vpop.f32.mrb[4].mxu1 }
 0xebb   :  { %v656_v43 = vadd.f32 %v652_v42, %v583_v41  ;;  %v1042_v44 = vpop.f32.mrb[5].mxu1 }
 0xebd   :  { %1164 = vtanh.f32 %v656_v43  ;;  %v932_v46 = vmul.f32 -1.442695, %v656_v43 }
 0xebf   :  { %1166 = vpow2.f32 %v932_v46 }
 0xec7   :  { %v1165_v45 = vpop.eup %1164 }
 0xec8   :  { %666 = vrot.lane.b32.xlu1 %v1165_v45, %s1267_s1 }
 0xec9   :  { %v1167_v47 = vpop.eup %1166 }
 0xeca   :  { %v660_v48 = vadd.f32 1.0, %v1167_v47 }
 0xecc   :  { %1168 = vrcp.f32 %v660_v48 }
 0xed6   :  { %v1169_v5 = vpop.eup %1168 }
 0xed7   :  { %v664_v0 = vmul.f32 %v1169_v5, %v569_v36 }
 0xf3a   :  { %v667_v49 = vpop.permute.xlu1 %666 }
 0xf3b   :  { %v669_v1 = vmul.f32 %v1169_v5, %v667_v49 }
 0xf3d   :  { %671 = vrot.lane.b32.xlu0 %v669_v1, %s1268_s6 }
 0xfaf   :  { %v672_v7 = vpop.permute.xlu0 %671 }
 0xfb0   :  { %v674_v50 = vadd.f32 %v672_v7, %v664_v0 }
 0xfb2   :  { %1170 = vtanh.f32 %v674_v50 }
 0xfbc   :  { %v1171_v51 = vpop.eup %1170 }
 0xfbd   :  { %677 = vrot.lane.b32.xlu1 %v1171_v51, %s1267_s1 }
0x102f   :  { %v678_v52 = vpop.permute.xlu1 %677 }
0x1030   :  { %v680_v53 = vmul.f32 %v1169_v5, %v678_v52 }
0x1032   :  { %682 = vrot.lane.b32.xlu0 %v680_v53, %s1268_s6 }
0x10a4   :  { %v683_v54 = vpop.permute.xlu0 %682 }
0x10a5   :  { %686 = vst.msk [vmem:[#allocation9 + $0x28] sm:$0xff] %vm44_vm0, %v683_v54  ;;  %1052 = vmatmul.mubr.msk.f32.vlgmr.msra.gmra.mrb[6].mxu0 %vm44_vm0, %v683_v54 }
0x1178   :  { %v757_v56 = vpop.f32.mrb[6].mxu0 }
0x1179   :  { %v761_v57 = vadd.f32 %v757_v56, %v688_v55  ;;  %v1053_v58 = vpop.f32.mrb[7].mxu0 }
0x117b   :  { %1172 = vtanh.f32 %v761_v57  ;;  %v934_v60 = vmul.f32 -1.442695, %v761_v57 }
0x117d   :  { %1174 = vpow2.f32 %v934_v60 }
0x1185   :  { %v1173_v59 = vpop.eup %1172 }
0x1186   :  { %771 = vrot.lane.b32.xlu1 %v1173_v59, %s1267_s1 }
0x1187   :  { %v1175_v61 = vpop.eup %1174 }
0x1188   :  { %v765_v62 = vadd.f32 1.0, %v1175_v61 }
0x118a   :  { %1176 = vrcp.f32 %v765_v62 }
0x1194   :  { %v1177_v63 = vpop.eup %1176 }
0x1195   :  { %v769_v4 = vmul.f32 %v1177_v63, %v674_v50 }
0x11f8   :  { %v772_v2 = vpop.permute.xlu1 %771 }
0x11f9   :  { %v774_v3 = vmul.f32 %v1177_v63, %v772_v2 }
0x11fb   :  { %776 = vrot.lane.b32.xlu0 %v774_v3, %s1268_s6 }
0x126d   :  { %v777_v6 = vpop.permute.xlu0 %776 }
0x126e   :  { %v779_v8 = vadd.f32 %v777_v6, %v769_v4 }
0x1270   :  { %1178 = vtanh.f32 %v779_v8 }
0x127a   :  { %v1179_v9 = vpop.eup %1178 }
0x127b   :  { %782 = vrot.lane.b32.xlu1 %v1179_v9, %s1267_s1 }
0x12ed   :  { %v783_v10 = vpop.permute.xlu1 %782 }
0x12ee   :  { %v785_v11 = vmul.f32 %v1177_v63, %v783_v10 }
0x12f0   :  { %787 = vrot.lane.b32.xlu0 %v785_v11, %s1268_s6 }
0x1362   :  { %v788_v12 = vpop.permute.xlu0 %787 }
0x1363   :  { %791 = vst.msk [vmem:[#allocation9 + $0x30] sm:$0xff] %vm44_vm0, %v788_v12  ;;  %1063 = vmatmul.mubr.msk.f32.vlgmr.msra.gmra.mrb[6].mxu1 %vm44_vm0, %v788_v12 }
0x1436   :  { %v862_v14 = vpop.f32.mrb[6].mxu1 }
0x1437   :  { %v866_v15 = vadd.f32 %v862_v14, %v793_v13  ;;  %v1064_v16 = vpop.f32.mrb[7].mxu1 }
0x1439   :  { %1180 = vtanh.f32 %v866_v15  ;;  %v936_v18 = vmul.f32 -1.442695, %v866_v15 }
0x143b   :  { %1182 = vpow2.f32 %v936_v18 }
0x1443   :  { %v1181_v17 = vpop.eup %1180 }
0x1444   :  { %876 = vrot.lane.b32.xlu1 %v1181_v17, %s1267_s1 }
0x1445   :  { %v1183_v19 = vpop.eup %1182 }
0x1446   :  { %v870_v20 = vadd.f32 1.0, %v1183_v19 }
0x1448   :  { %1184 = vrcp.f32 %v870_v20 }
0x1452   :  { %v1185_v21 = vpop.eup %1184 }
0x1453   :  { %v874_v24 = vmul.f32 %v1185_v21, %v779_v8 }
0x14b6   :  { %v877_v22 = vpop.permute.xlu1 %876 }
0x14b7   :  { %v879_v23 = vmul.f32 %v1185_v21, %v877_v22 }
0x14b9   :  { %881 = vrot.lane.b32.xlu0 %v879_v23, %s1268_s6 }
0x152b   :  { %v882_v25 = vpop.permute.xlu0 %881 }
0x152c   :  { %v884_v26 = vadd.f32 %v882_v25, %v874_v24 }
0x152e   :  { %1186 = vtanh.f32 %v884_v26 }
0x1538   :  { %v1187_v27 = vpop.eup %1186 }
0x1539   :  { %887 = vrot.lane.b32.xlu1 %v1187_v27, %s1267_s1 }
0x153d   :  { %899 = vrot.lane.b32.xlu1 %v884_v26, %s1269_s7 }
0x15ab   :  { %v888_v28 = vpop.permute.xlu1 %887 }
0x15ac   :  { %v890_v29 = vmul.f32 %v1185_v21, %v888_v28 }
0x15ae   :  { %892 = vrot.lane.b32.xlu0 %v890_v29, %s1268_s6 }
0x15af   :  { %v900_v30 = vpop.permute.xlu1 %899 }
0x15b0   :  { %902 = vst.msk [vmem:[#allocation3] sm:$0xff] %vm44_vm0, %v900_v30 }
0x1620   :  { %v893_v31 = vpop.permute.xlu0 %892 }
0x1621   :  { %896 = vst.msk [vmem:[#allocation9 + $0x38] sm:$0xff] %vm44_vm0, %v893_v31  ;;  %897 = vst.msk [vmem:[#allocation2] sm:$0xff] %vm44_vm0, %v893_v31 }
0x1622   :  { %1243 = shalt.err (!%p1240_p6)
}
0x1623   :  { %s1244_s13 = scalar_lea.hbm %s1440_s2, 1024 }
0x1624   :  { %p1245_p7 = scmp.ne.s32.totalorder %s1440_s2, %s1244_s13  ;;  %p1248_p8 = scmp.lt.u32.totalorder %s1244_s13, %s1440_s2 }
0x1626   :  { %p1250_p9 = pnand %p1248_p8, %p1245_p7 }
0x1628   :  { %1253 = shalt.err (!%p1250_p9)
}
0x1629   :  { %914 = dma.vmem_to_hbm [thread:$0]  %s909_s9, 1024, %s1440_s2, [#allocation6], %s1261_s19, %s1261_s19, %s1262_s20  }
0x162a   :  { %1258 = dma.done.wait [#allocation6], 1024  }
0x162b   :  { %1259 = vsyncadd [#allocation6], 4294966272 }
0x162c   :  { %918 = vsyncpa [#allocation5], 1 }
0x162d   :  { %919 = vsyncpa [#allocation8], 1 }
0x162e   :  { %920 = vsyncpa [#allocation6], 1 }

</bundles_post_ra>
